<compile_context>
chip_gen: v5e
topology: v5e:2x2
jax: 0.10.0
libtpu: 0.0.40
codegen_flags: <defaults>
</compile_context>

<pallas_src>
import functools

import jax
import jax.numpy as jnp
from jax.experimental import pallas as pl
from jax.experimental.pallas import tpu as pltpu


def _distill_kl_kernel(ys_ref, yt_ref, loss_ref, *, inv_T, T2):
    # [TB, C] tile of student / teacher logits; all math in f32.
    ys = ys_ref[...].astype(jnp.float32) * inv_T
    yt = yt_ref[...].astype(jnp.float32) * inv_T

    # Numerically stable shifted logits.
    ys_shift = ys - jnp.max(ys, axis=-1, keepdims=True)
    yt_shift = yt - jnp.max(yt, axis=-1, keepdims=True)

    # log Z_s (student partition function).
    log_z_s = jnp.log(jnp.sum(jnp.exp(ys_shift), axis=-1, keepdims=True))

    # Teacher-weighted logit gap.
    diff = yt_shift - ys_shift
    exp_t = jnp.exp(yt_shift)
    z_t = jnp.sum(exp_t, axis=-1, keepdims=True)
    s = jnp.sum(exp_t * diff, axis=-1, keepdims=True)

    # KL_row = (1/z_t) * s + log z_s - log z_t, then * T^2.
    # (approx=False keeps the 1e-5 self-test tolerance; approx=True is a free
    #  EUP slot if a looser tolerance is acceptable.)
    inv_z_t = pl.reciprocal(z_t, approx=False)
    row_loss = inv_z_t * s + log_z_s - jnp.log(z_t)
    loss_ref[...] = row_loss * T2


def _round_up(x, m):
    return (x + m - 1) // m * m


def _budget_tile_rows(C, itemsize, budget_bytes=24 * 1024 * 1024):
    """Largest batch tile (multiple of 8) whose double-buffered input blocks
    plus ~6 f32 [TB, C] in-kernel temporaries fit a conservative VMEM budget
    (sized for v7x's 64 MiB VMEM; v5e/v6e have headroom to spare)."""
    per_row = C * (4 * itemsize + 6 * 4)  # 2 inputs x 2 buffers + temporaries
    tb = (budget_bytes // per_row) // 8 * 8
    return int(max(8, min(tb, 1024)))


def _largest_div8_tile(n, cap):
    """Largest multiple of 8 that divides n (requires n % 8 == 0), <= cap."""
    t = min(n, max(8, (cap // 8) * 8))
    while n % t:
        t -= 8
    return t


def _choose_tiling(B, C, itemsize):
    """Returns (tb, num_tiles, Bp).  Avoids wrapper-side padding (an extra
    full HBM copy of both inputs) whenever B already admits a legal blocking."""
    tb_budget = _budget_tile_rows(C, itemsize)
    if B % 8 != 0:
        if B <= tb_budget:
            return B, 1, B                      # full-extent block: no pad
        Bp = _round_up(B, 8)                    # rare: ragged large batch
        tb = _largest_div8_tile(Bp, tb_budget)
        return tb, Bp // tb, Bp
    # B is a multiple of 8: tile with a divisor of B, never pad.  Prefer >= 2
    # tiles so the "parallel" grid axis can shard across TCs (v7x) and the
    # input DMA pipelines against compute.
    cap = tb_budget if B < 16 else min(tb_budget, max(8, ((B // 2) // 8) * 8))
    tb = _largest_div8_tile(B, cap)
    return tb, B // tb, B


def distill_kl(y_s, y_t, T, is_ca=False, tile_rows=None):
    """Pallas implementation of DistillKL.forward(y_s, y_t, is_ca).

    y_s / y_t: [B, C] logits (f32 or bf16; bf16 halves HBM traffic).
    Returns f32: per-sample loss [B] if is_ca else the 'batchmean' scalar.
    """
    assert y_s.shape == y_t.shape and y_s.ndim == 2
    B, C = y_s.shape
    itemsize = jnp.dtype(y_s.dtype).itemsize

    if tile_rows is None:
        tb, num_tiles, Bp = _choose_tiling(B, C, itemsize)
    else:
        tb = _round_up(max(8, min(int(tile_rows), 1024)), 8)
        tb = min(tb, _round_up(B, 8))
        num_tiles = pl.cdiv(B, tb)
        Bp = num_tiles * tb

    if Bp != B:
        # Zero rows -> identical uniform student/teacher distributions ->
        # exactly 0 loss, so 'batchmean' still divides by the true B below.
        pad = ((0, Bp - B), (0, 0))
        y_s = jnp.pad(y_s, pad)
        y_t = jnp.pad(y_t, pad)

    kernel = functools.partial(
        _distill_kl_kernel, inv_T=1.0 / float(T), T2=float(T) * float(T))

    row_loss = pl.pallas_call(
        kernel,
        out_shape=jax.ShapeDtypeStruct((Bp, 1), jnp.float32),
        grid=(num_tiles,),
        in_specs=[
            pl.BlockSpec((tb, C), lambda i: (i, 0)),
            pl.BlockSpec((tb, C), lambda i: (i, 0)),
        ],
        out_specs=pl.BlockSpec((tb, 1), lambda i: (i, 0)),
        compiler_params=pltpu.CompilerParams(
            dimension_semantics=("parallel",),
            vmem_limit_bytes=40 * 1024 * 1024,
        ),
    )(y_s, y_t)

    if is_ca:
        # KLDivLoss(reduction='none')(p_s, p_t).sum(-1) * T**2
        return row_loss[:B, 0]
    # KLDivLoss(reduction='batchmean') * T**2 == total sum / true batch size.
    return jnp.sum(row_loss) / B


def _distill_kl_ref(y_s, y_t, T, is_ca=False):
    """Pure-JAX reference matching the PyTorch module (math in f32)."""
    y_s = y_s.astype(jnp.float32)
    y_t = y_t.astype(jnp.float32)
    log_p_s = jax.nn.log_softmax(y_s / T, axis=1)
    p_t = jax.nn.softmax(y_t / T, axis=1)
    log_p_t = jax.nn.log_softmax(y_t / T, axis=1)
    elem = p_t * (log_p_t - log_p_s) * (T ** 2)
    if is_ca:
        return elem.sum(-1)
    return elem.sum() / y_s.shape[0]


if __name__ == "__main__":
    T = 4.0
    key = jax.random.PRNGKey(0)

    # (B, C, input dtype, tile_rows override, tol)
    cases = [
        (8, 32, jnp.float32, None, 1e-5),    # single tile, tiny C
        (13, 100, jnp.float32, None, 1e-5),  # ragged B -> full-extent tile, no pad
        (13, 100, jnp.float32, 8, 1e-5),     # forced tb=8 -> padded 13->16, 2 steps
        (16, 384, jnp.float32, None, 1e-5),  # auto multi-tile (2x8), no pad
        (24, 256, jnp.bfloat16, 8, 1e-4),    # bf16 inputs, 3 grid steps, no pad
    ]

    for B, C, dtype, tile_rows, tol in cases:
        key, k_s, k_t = jax.random.split(key, 3)
        y_s = jax.random.normal(k_s, (B, C), dtype=jnp.float32).astype(dtype)
        y_t = jax.random.normal(k_t, (B, C), dtype=jnp.float32).astype(dtype)

        # batchmean branch (is_ca=False)
        loss = jax.block_until_ready(
            distill_kl(y_s, y_t, T, is_ca=False, tile_rows=tile_rows))
        # per-sample branch (is_ca=True)
        loss_ca = jax.block_until_ready(
            distill_kl(y_s, y_t, T, is_ca=True, tile_rows=tile_rows))

        ref = _distill_kl_ref(y_s, y_t, T, is_ca=False)
        ref_ca = _distill_kl_ref(y_s, y_t, T, is_ca=True)
        assert jnp.allclose(loss, ref, atol=tol, rtol=tol), (B, C, loss, ref)
        assert jnp.allclose(loss_ca, ref_ca, atol=tol, rtol=tol), (B, C)

    print("KERNEL_OK")
</pallas_src>

<mosaic_0001>
module attributes {stable_mosaic.version = 11 : i64} {
  func.func @_distill_kl_kernel(%arg0: i32, %arg1: memref<8x32xf32, #tpu.memory_space<vmem>>, %arg2: memref<8x32xf32, #tpu.memory_space<vmem>>, %arg3: memref<8x1xf32, #tpu.memory_space<vmem>>) attributes {dimension_semantics = [#tpu.dimension_semantics<parallel>], iteration_bounds = array<i64: 1>, scalar_prefetch = 0 : i64, scratch_operands = 0 : i64, tpu.core_type = #tpu.core_type<tc>, window_params = [{transform_indices = @transform_0, window_bounds = array<i64: 8, 32>}, {transform_indices = @transform_1, window_bounds = array<i64: 8, 32>}, {transform_indices = @transform_2, window_bounds = array<i64: 8, 1>}]} {
    %c0 = arith.constant 0 : index
    %c0_0 = arith.constant 0 : index
    %0 = vector.load %arg1[%c0, %c0_0] : memref<8x32xf32, #tpu.memory_space<vmem>>, vector<8x32xf32>
    %cst = arith.constant 2.500000e-01 : f32
    %1 = vector.broadcast %cst : f32 to vector<8x32xf32>
    %2 = arith.mulf %0, %1 : vector<8x32xf32>
    %c0_1 = arith.constant 0 : index
    %c0_2 = arith.constant 0 : index
    %3 = vector.load %arg2[%c0_1, %c0_2] : memref<8x32xf32, #tpu.memory_space<vmem>>, vector<8x32xf32>
    %cst_3 = arith.constant 2.500000e-01 : f32
    %4 = vector.broadcast %cst_3 : f32 to vector<8x32xf32>
    %5 = arith.mulf %3, %4 : vector<8x32xf32>
    %cst_4 = arith.constant dense<0xFF800000> : vector<8xf32>
    %6 = vector.multi_reduction <maximumf>, %2, %cst_4 [1] : vector<8x32xf32> to vector<8xf32>
    %7 = vector.shape_cast %6 : vector<8xf32> to vector<8x1xf32>
    %8 = vector.broadcast %7 : vector<8x1xf32> to vector<8x32xf32>
    %9 = arith.subf %2, %8 : vector<8x32xf32>
    %cst_5 = arith.constant dense<0xFF800000> : vector<8xf32>
    %10 = vector.multi_reduction <maximumf>, %5, %cst_5 [1] : vector<8x32xf32> to vector<8xf32>
    %11 = vector.shape_cast %10 : vector<8xf32> to vector<8x1xf32>
    %12 = vector.broadcast %11 : vector<8x1xf32> to vector<8x32xf32>
    %13 = arith.subf %5, %12 : vector<8x32xf32>
    %14 = math.exp %9 : vector<8x32xf32>
    %cst_6 = arith.constant dense<0.000000e+00> : vector<8xf32>
    %15 = vector.multi_reduction <add>, %14, %cst_6 [1] : vector<8x32xf32> to vector<8xf32>
    %16 = vector.shape_cast %15 : vector<8xf32> to vector<8x1xf32>
    %17 = math.log %16 : vector<8x1xf32>
    %18 = arith.subf %13, %9 : vector<8x32xf32>
    %19 = math.exp %13 : vector<8x32xf32>
    %cst_7 = arith.constant dense<0.000000e+00> : vector<8xf32>
    %20 = vector.multi_reduction <add>, %19, %cst_7 [1] : vector<8x32xf32> to vector<8xf32>
    %21 = vector.shape_cast %20 : vector<8xf32> to vector<8x1xf32>
    %22 = arith.mulf %19, %18 : vector<8x32xf32>
    %cst_8 = arith.constant dense<0.000000e+00> : vector<8xf32>
    %23 = vector.multi_reduction <add>, %22, %cst_8 [1] : vector<8x32xf32> to vector<8xf32>
    %24 = vector.shape_cast %23 : vector<8xf32> to vector<8x1xf32>
    %25 = tpu.reciprocal %21 : vector<8x1xf32> -> vector<8x1xf32>
    %26 = arith.mulf %25, %24 : vector<8x1xf32>
    %27 = arith.addf %26, %17 : vector<8x1xf32>
    %28 = math.log %21 : vector<8x1xf32>
    %29 = arith.subf %27, %28 : vector<8x1xf32>
    %cst_9 = arith.constant 1.600000e+01 : f32
    %30 = vector.broadcast %cst_9 : f32 to vector<8x1xf32>
    %31 = arith.mulf %29, %30 : vector<8x1xf32>
    %c0_10 = arith.constant 0 : index
    %c0_11 = arith.constant 0 : index
    %32 = vector.load %arg3[%c0_10, %c0_11] : memref<8x1xf32, #tpu.memory_space<vmem>>, vector<8x1xf32>
    tpu.vector_store %arg3[%c0_10, %c0_11], %31 {strides = array<i32>} : memref<8x1xf32, #tpu.memory_space<vmem>>, vector<8x1xf32>,
    return
  }
  func.func @transform_0(%arg0: i32) -> (i32, i32) {
    %c0_i32 = arith.constant 0 : i32
    %c0_i32_0 = arith.constant 0 : i32
    return %arg0, %c0_i32 : i32, i32
  }
  func.func @transform_1(%arg0: i32) -> (i32, i32) {
    %c0_i32 = arith.constant 0 : i32
    %c0_i32_0 = arith.constant 0 : i32
    return %arg0, %c0_i32 : i32, i32
  }
  func.func @transform_2(%arg0: i32) -> (i32, i32) {
    %c0_i32 = arith.constant 0 : i32
    %c0_i32_0 = arith.constant 0 : i32
    return %arg0, %c0_i32 : i32, i32
  }
}

</mosaic_0001>

<bundles_post_ra>
// kernel: tpu_custom_call.1
= control target key start
LH: loop header
LB: loop body
LE: loop exit
PB: predicated region body
PF: predicated region fallthrough
CT: control target
= control target key end

     0   :  { %7 = vsyncpa [#allocation3], 0  ;;  %s192_s0 = inlined_call_operand.hbm [shape: f32[8,32], index: 0, kind: input, shape index: {}]   ;;  %s193_s1 = inlined_call_operand.hbm [shape: f32[8,32], index: 1, kind: input, shape index: {}]   ;;  %s194_s2 = inlined_call_operand.vmem [shape: f32[8,1], index: 2, kind: output, shape index: {}]  }
   0x1   :  { %s14_s11 = sshll.u32 %s192_s0, 4  ;;  %s15_s11 = int_to_ptr.hbm [resolvable:$true] %s14_s11 }
   0x2   :  { %8 = vsyncpa [#allocation5], 0  ;;  %s161_s12 = smov [#allocation2]   ;;  %s25_s16 = sshll.u32 %s193_s1, 4  ;;  %s26_s16 = int_to_ptr.hbm [resolvable:$true] %s25_s16 }
   0x3   :  { %s16_s13 = sshll.u32 %s161_s12, 4  ;;  %s162_s17 = smov [#allocation4]   ;;  %s17_s13 = int_to_ptr.vmem [resolvable:$true] %s16_s13 }
   0x4   :  { %19 = dma.hbm_to_vmem [thread:$0]  %s15_s11, 128, %s17_s13, [#allocation3]  }
   0x5   :  { %s27_s18 = sshll.u32 %s162_s17, 4  ;;  %s28_s18 = int_to_ptr.vmem [resolvable:$true] %s27_s18 }
   0x6   :  { %30 = dma.hbm_to_vmem [thread:$0]  %s26_s16, 128, %s28_s18, [#allocation5]  }
   0x7   :  { %157 = dma.done.wait [#allocation3], 128  }
   0x8   :  { %158 = vsyncadd [#allocation3], 4294967168 }
   0x9   :  { %159 = dma.done.wait [#allocation5], 128  }
   0xa   :  { %160 = vsyncadd [#allocation5], 4294967168  ;;  %v41_v0 = vld [vmem:[#allocation4] sm:$0xff]  ;;  %vm43_vm0 = vcmask 261120   ;;  %v39_v2 = vld [vmem:[#allocation2] sm:$0xff]  ;;  %vm89_vm5 = vcmask 7168  }
   0xb   :  { %v42_v1 = vmul.f32 0.25, %v41_v0  ;;  %v40_v4 = vmul.f32 0.25, %v39_v2 }
   0xd   :  { %v48_v3 = vsel %vm43_vm0, %v42_v1, -inf  ;;  %v44_v5 = vsel %vm43_vm0, %v40_v4, -inf }
   0xe   :  { %49 = vmax.xlane.f32.xlu0 %v48_v3 }
  0x16   :  { %45 = vmax.xlane.f32.xlu0 %v44_v5 }
  0x81   :  { %v50_v6 = vpop.xlane.xlu0 %49 }
  0x82   :  { %v51_v7 = vsub.f32 %v42_v1, %v50_v6 }
  0x84   :  { %v60_v8 = vmul.f32 1.442695, %v51_v7 }
  0x86   :  { %99 = vpow2.f32 %v60_v8 }
  0x89   :  { %v46_v9 = vpop.xlane.xlu0 %45 }
  0x8a   :  { %v47_v10 = vsub.f32 %v40_v4, %v46_v9 }
  0x8c   :  { %v100_v11 = vpop.eup %99  ;;  %v52_v12 = vmul.f32 1.442695, %v47_v10  ;;  %v59_v13 = vsub.f32 %v51_v7, %v47_v10 }
  0x8d   :  { %v62_v14 = vsel %vm43_vm0, %v100_v11, 0.0 }
  0x8e   :  { %101 = vpow2.f32 %v52_v12  ;;  %63 = vadd.xlane.f32.xlu1 %v62_v14  ;;  %v65_v15 = vmul.f32 %v100_v11, %v59_v13 }
  0x90   :  { %v66_v16 = vsel %vm43_vm0, %v65_v15, 0.0 }
  0x91   :  { %67 = vadd.xlane.f32.xlu2 %v66_v16 }
  0x94   :  { %v102_v17 = vpop.eup %101 }
  0x95   :  { %v54_v18 = vsel %vm43_vm0, %v102_v17, 0.0 }
  0x96   :  { %55 = vadd.xlane.f32.xlu1 %v54_v18 }
 0x101   :  { %v64_v19 = vpop.xlane.xlu1 %63 }
 0x102   :  { %103 = vrcp.f32 %v64_v19  ;;  %v80_v24 = vand.u32 2147483648, %v64_v19  ;;  %v78_v26 = vand.u32 2147483647, %v64_v19  ;;  %vm74_vm2 = vweird.f32 %v64_v19 }
 0x104   :  { %v81_v29 = vor.u32 1.1754944e-38, %v80_v24  ;;  %vm79_vm4 = vcmp.eq.f32.partialorder %v78_v26, 8.507059e+37  ;;  %v68_v34 = vpop.xlane.xlu2 %67 }
 0x108   :  { %v104_v20 = vpop.eup %103 }
 0x109   :  { %v70_v21 = vmul.f32 %v104_v20, %v64_v19  ;;  %v56_v22 = vpop.xlane.xlu1 %55  ;;  %vm75_vm1 = vweird.f32 %v104_v20 }
 0x10a   :  { %105 = vlog2.f32 %v56_v22  ;;  %vm76_vm3 = vmor %vm74_vm2, %vm75_vm1 }
 0x10b   :  { %v71_v23 = vsub.f32 1.0, %v70_v21  ;;  %107 = vlog2.f32 %v64_v19 }
 0x10d   :  { %v72_v25 = vmul.f32 %v104_v20, %v71_v23 }
 0x10f   :  { %v73_v27 = vadd.f32 %v104_v20, %v72_v25 }
 0x110   :  { %v106_v28 = vpop.eup %105 }
 0x111   :  { %v77_v30 = vsel %vm76_vm3, %v104_v20, %v73_v27  ;;  %v58_v31 = vmul.f32 0.6931472, %v106_v28  ;;  %v108_v32 = vpop.eup %107 }
 0x112   :  { %v82_v33 = vsel %vm79_vm4, %v81_v29, %v77_v30  ;;  %v86_v36 = vmul.f32 0.6931472, %v108_v32 }
 0x113   :  { %v83_v35 = vmul.f32 %v82_v33, %v68_v34 }
 0x115   :  { %v84_v37 = vadd.f32 %v83_v35, %v58_v31 }
 0x117   :  { %v87_v38 = vsub.f32 %v84_v37, %v86_v36 }
 0x119   :  { %v88_v39 = vmul.f32 16.0, %v87_v38 }
 0x11b   :  { %90 = vst.msk [vmem:[%s194_s2] sm:$0xff] %vm89_vm5, %v88_v39 }
 0x11c   :  { %95 = vsyncpa [#allocation3], 1 }
 0x11d   :  { %96 = vsyncpa [#allocation5], 1 }

</bundles_post_ra>
